<compile_context>
chip_gen: v5e
topology: v5e:2x2
jax: 0.10.0
libtpu: 0.0.40
codegen_flags: <defaults>
</compile_context>

<pallas_src>
import functools

import jax
import jax.numpy as jnp
from jax.experimental import pallas as pl
from jax.experimental.pallas import tpu as pltpu

BN_EPS = 1e-5
_LANE = 128        # feature dims padded to multiples of this (lane-dense)
_SUBLANE = 16      # bf16 sublane packing: batch dim padded to multiples of this
_BASE_TILE = 512   # base feature-axis tile


def _vmem_capacity_bytes():
    try:
        return int(pltpu.get_tpu_info().vmem_capacity_bytes)
    except Exception:
        return 64 << 20   # conservative default (v7x per-TC VMEM)


_VMEM_CAP = _vmem_capacity_bytes()
_VMEM_SOFT_CAP = min(_VMEM_CAP * 3 // 4, 100 << 20)   # limit handed to Mosaic
_BIG_VMEM = _VMEM_CAP >= (100 << 20)                  # v5e/v6e (128 MiB) vs v7x (64 MiB)


# ---------------------------------------------------------------------------
# Padding / tiling helpers
# ---------------------------------------------------------------------------
def _round_up(v, m):
    return (v + m - 1) // m * m


def _pad_dim(d):
    """Pad a feature dim so it is lane-dense and divisible by its tile."""
    p = _round_up(d, _LANE)
    if p > _BASE_TILE:
        p = _round_up(p, _BASE_TILE)
    return p


def _tile_for(p):
    if p <= _BASE_TILE:
        return p
    if _BIG_VMEM and p % 1024 == 0:
        return 1024
    return _BASE_TILE


def _pad2(a, rows, cols):
    pr, pc = rows - a.shape[0], cols - a.shape[1]
    if pr or pc:
        a = jnp.pad(a, ((0, pr), (0, pc)))
    return a


def _pad_row(v, cols):
    return _pad2(v.reshape(1, -1).astype(jnp.float32), 1, cols)


def _tiled_vmem_limit(n_pad, tk, tn):
    est = (
        2 * n_pad * tk * 2      # x tiles, double-buffered, bf16
        + 2 * tk * tn * 2       # W tiles, double-buffered, bf16
        + 2 * n_pad * tn * 4    # output tiles, double-buffered (<= f32)
        + n_pad * tn * 4        # f32 accumulator scratch
        + 8 * tn * 4            # bias / gamma / beta tiles
    )
    est = int(est * 1.5) + (2 << 20)
    return int(min(max(est, 32 << 20), _VMEM_SOFT_CAP))


# ---------------------------------------------------------------------------
# Shared BN + ReLU epilogue (two-pass variance; mask only if batch is padded)
# ---------------------------------------------------------------------------
def _bn_relu(h, gamma, beta, n_actual):
    """h: (n_pad, tn) f32 pre-activation; gamma/beta: (1, tn) f32."""
    n_pad = h.shape[0]
    if n_pad != n_actual:
        rows = jax.lax.broadcasted_iota(jnp.int32, h.shape, 0)
        valid = rows < n_actual
        hm = jnp.where(valid, h, 0.0)
    else:
        valid = None
        hm = h
    inv_n = 1.0 / float(n_actual)
    mean = jnp.sum(hm, axis=0, keepdims=True) * inv_n
    d = h - mean
    ds = d if valid is None else jnp.where(valid, d, 0.0)
    var = jnp.sum(ds * ds, axis=0, keepdims=True) * inv_n   # biased variance
    y = d * jax.lax.rsqrt(var + BN_EPS) * gamma + beta
    return jnp.maximum(y, 0.0)


# ---------------------------------------------------------------------------
# Fused whole-network kernel (single pallas_call, everything VMEM-resident)
# ---------------------------------------------------------------------------
def _make_fused_kernel(num_layers, n_actual):
    def kernel(*refs):
        x_ref, o_ref = refs[0], refs[-1]
        h = x_ref[...]                                  # bf16 (n_pad, d_in_pad)
        idx = 1
        for _ in range(num_layers - 1):
            w_ref, b_ref, g_ref, bt_ref = refs[idx:idx + 4]
            idx += 4
            z = jnp.dot(h, w_ref[...],
                        preferred_element_type=jnp.float32) + b_ref[...]
            h = _bn_relu(z, g_ref[...], bt_ref[...], n_actual).astype(jnp.bfloat16)
        w_ref, b_ref = refs[idx], refs[idx + 1]
        out = jnp.dot(h, w_ref[...],
                      preferred_element_type=jnp.float32) + b_ref[...]
        o_ref[...] = out.astype(o_ref.dtype)
    return kernel


def _fused_vmem_estimate(n_pad, d_in_pad, lin_p, bn_p):
    widths = [d_in_pad] + [w.shape[1] for (w, _) in lin_p]
    est = n_pad * d_in_pad * 2                      # x (bf16)
    est += n_pad * lin_p[-1][0].shape[1] * 4        # output (f32)
    for (w, b) in lin_p:
        est += w.size * 2 + b.size * 4
    for (g, bt) in bn_p:
        est += (g.size + bt.size) * 4
    est += 4 * n_pad * max(widths) * 4              # activation temporaries
    return int(est * 1.25) + (4 << 20)


def _fused_forward(xp, lin_p, bn_p, num_layers, n_actual, vmem_limit):
    n_pad = xp.shape[0]
    inputs = [xp]
    for i in range(num_layers - 1):
        wp, bp = lin_p[i]
        gp, btp = bn_p[i]
        inputs += [wp, bp, gp, btp]
    wp, bp = lin_p[-1]
    inputs += [wp, bp]
    m_out_pad = wp.shape[1]
    kernel = _make_fused_kernel(num_layers, n_actual)
    return pl.pallas_call(
        kernel,
        out_shape=jax.ShapeDtypeStruct((n_pad, m_out_pad), jnp.float32),
        compiler_params=pltpu.CompilerParams(vmem_limit_bytes=vmem_limit),
    )(*inputs)


# ---------------------------------------------------------------------------
# Tiled fallback kernels (per layer)
# ---------------------------------------------------------------------------
def _linear_1k_kernel(x_ref, w_ref, b_ref, o_ref):
    o_ref[...] = (
        jnp.dot(x_ref[...], w_ref[...], preferred_element_type=jnp.float32)
        + b_ref[...]
    ).astype(o_ref.dtype)


def _linear_mk_kernel(x_ref, w_ref, b_ref, o_ref, acc_ref):
    k = pl.program_id(1)

    @pl.when(k == 0)
    def _():
        acc_ref[...] = jnp.zeros_like(acc_ref)

    acc_ref[...] += jnp.dot(
        x_ref[...], w_ref[...], preferred_element_type=jnp.float32
    )

    @pl.when(k == pl.num_programs(1) - 1)
    def _():
        o_ref[...] = (acc_ref[...] + b_ref[...]).astype(o_ref.dtype)


def _linear_bn_relu_1k_kernel(x_ref, w_ref, b_ref, g_ref, bt_ref, o_ref, *,
                              n_actual):
    h = jnp.dot(x_ref[...], w_ref[...],
                preferred_element_type=jnp.float32) + b_ref[...]
    o_ref[...] = _bn_relu(h, g_ref[...], bt_ref[...], n_actual).astype(o_ref.dtype)


def _linear_bn_relu_mk_kernel(x_ref, w_ref, b_ref, g_ref, bt_ref, o_ref,
                              acc_ref, *, n_actual):
    k = pl.program_id(1)

    @pl.when(k == 0)
    def _():
        acc_ref[...] = jnp.zeros_like(acc_ref)

    acc_ref[...] += jnp.dot(
        x_ref[...], w_ref[...], preferred_element_type=jnp.float32
    )

    @pl.when(k == pl.num_programs(1) - 1)
    def _():
        h = acc_ref[...] + b_ref[...]
        o_ref[...] = _bn_relu(h, g_ref[...], bt_ref[...], n_actual).astype(o_ref.dtype)


def _launch_tiled(kernel_1k, kernel_mk, xp, wp, extras, out_dtype):
    n_pad, k_pad = xp.shape
    m_pad = wp.shape[1]
    tk, tn = _tile_for(k_pad), _tile_for(m_pad)

    if k_pad == tk:
        # Single K tile: no reduction axis, no accumulator, no pl.when.
        grid = (m_pad // tn,)
        in_specs = (
            [pl.BlockSpec((n_pad, k_pad), lambda j: (0, 0)),
             pl.BlockSpec((k_pad, tn), lambda j: (0, j))]
            + [pl.BlockSpec((1, tn), lambda j: (0, j))] * len(extras)
        )
        out_specs = pl.BlockSpec((n_pad, tn), lambda j: (0, j))
        scratch = []
        kernel = kernel_1k
        sems = ("parallel",)
    else:
        grid = (m_pad // tn, k_pad // tk)
        in_specs = (
            [pl.BlockSpec((n_pad, tk), lambda j, k: (0, k)),
             pl.BlockSpec((tk, tn), lambda j, k: (k, j))]
            + [pl.BlockSpec((1, tn), lambda j, k: (0, j))] * len(extras)
        )
        out_specs = pl.BlockSpec((n_pad, tn), lambda j, k: (0, j))
        scratch = [pltpu.VMEM((n_pad, tn), jnp.float32)]
        kernel = kernel_mk
        sems = ("parallel", "arbitrary")

    return pl.pallas_call(
        kernel,
        out_shape=jax.ShapeDtypeStruct((n_pad, m_pad), out_dtype),
        grid_spec=pltpu.PrefetchScalarGridSpec(
            num_scalar_prefetch=0,
            grid=grid,
            in_specs=in_specs,
            out_specs=out_specs,
            scratch_shapes=scratch,
        ),
        compiler_params=pltpu.CompilerParams(
            dimension_semantics=sems,
            vmem_limit_bytes=_tiled_vmem_limit(n_pad, tk, tn),
        ),
    )(xp, wp, *extras)


def _tiled_forward(xp, lin_p, bn_p, num_layers, n_actual):
    for i in range(num_layers - 1):
        wp, bp = lin_p[i]
        gp, btp = bn_p[i]
        k1 = functools.partial(_linear_bn_relu_1k_kernel, n_actual=n_actual)
        kmk = functools.partial(_linear_bn_relu_mk_kernel, n_actual=n_actual)
        xp = _launch_tiled(k1, kmk, xp, wp, (bp, gp, btp), jnp.bfloat16)
    wp, bp = lin_p[-1]
    return _launch_tiled(_linear_1k_kernel, _linear_mk_kernel, xp, wp, (bp,),
                         jnp.float32)


# ---------------------------------------------------------------------------
# Parameters: init (torch-like), one-time prepare (pad + cast), forward
# ---------------------------------------------------------------------------
def init_mlp_params(key, num_layers, input_dim, hidden_dim, output_dim):
    """Mirror torch layer shapes; weights stored as (in_dim, out_dim)."""
    if num_layers < 1:
        raise ValueError("num_layers must be a positive integer.")
    params = {"linears": [], "bns": []}

    def init_linear(k, d_in, d_out):
        kw, kb = jax.random.split(k)
        bound = 1.0 / jnp.sqrt(float(d_in))
        w = jax.random.uniform(kw, (d_in, d_out), jnp.float32, -bound, bound)
        b = jax.random.uniform(kb, (d_out,), jnp.float32, -bound, bound)
        return w, b

    if num_layers == 1:
        key, k0 = jax.random.split(key)
        params["linears"].append(init_linear(k0, input_dim, output_dim))
        return params

    dims = [input_dim] + [hidden_dim] * (num_layers - 1) + [output_dim]
    for i in range(num_layers):
        key, k = jax.random.split(key)
        params["linears"].append(init_linear(k, dims[i], dims[i + 1]))
    for _ in range(num_layers - 1):
        params["bns"].append(
            (jnp.ones((hidden_dim,), jnp.float32),
             jnp.zeros((hidden_dim,), jnp.float32))
        )
    return params


def prepare_mlp_params(params):
    """One-time pad + cast of the parameters to the kernel layout (bf16 W)."""
    prepared = {"linears": [], "bns": []}
    for (w, b) in params["linears"]:
        k_pad, m_pad = _pad_dim(w.shape[0]), _pad_dim(w.shape[1])
        prepared["linears"].append(
            (_pad2(w, k_pad, m_pad).astype(jnp.bfloat16), _pad_row(b, m_pad))
        )
    for (g, bt) in params["bns"]:
        m_pad = _pad_dim(g.shape[0])
        prepared["bns"].append((_pad_row(g, m_pad), _pad_row(bt, m_pad)))
    return prepared


@functools.partial(jax.jit,
                   static_argnames=("num_layers", "output_dim", "use_fused"))
def mlp_forward(prepared, x, num_layers, output_dim, use_fused=None):
    lin_p, bn_p = prepared["linears"], prepared["bns"]
    n = x.shape[0]
    n_pad = _round_up(max(n, _SUBLANE), _SUBLANE)
    d_in_pad = lin_p[0][0].shape[0]
    xp = _pad2(x, n_pad, d_in_pad).astype(jnp.bfloat16)

    est = _fused_vmem_estimate(n_pad, d_in_pad, lin_p, bn_p)
    fused = (est <= _VMEM_SOFT_CAP) if use_fused is None else use_fused

    if fused:
        limit = int(min(max(est, 32 << 20), _VMEM_SOFT_CAP))
        out = _fused_forward(xp, lin_p, bn_p, num_layers, n, limit)
    else:
        out = _tiled_forward(xp, lin_p, bn_p, num_layers, n)
    return out[:n, :output_dim]


# ---------------------------------------------------------------------------
# Reference (matches torch training-mode BN at matched precision:
# bf16 matmul operands, f32 accumulation, bf16 inter-layer activations)
# ---------------------------------------------------------------------------
def mlp_reference(params, x, num_layers):
    def mm(a, w):
        return jnp.dot(a.astype(jnp.bfloat16), w.astype(jnp.bfloat16),
                       preferred_element_type=jnp.float32)

    if num_layers == 1:
        w, b = params["linears"][0]
        return mm(x, w) + b
    h = x
    for i in range(num_layers - 1):
        w, b = params["linears"][i]
        gamma, beta = params["bns"][i]
        z = mm(h, w) + b
        mean = jnp.mean(z, axis=0, keepdims=True)
        var = jnp.mean((z - mean) ** 2, axis=0, keepdims=True)
        z = (z - mean) * jax.lax.rsqrt(var + BN_EPS)
        h = jnp.maximum(z * gamma + beta, 0.0)
    w, b = params["linears"][-1]
    return mm(h, w) + b


if __name__ == "__main__":
    key = jax.random.PRNGKey(0)
    kx, kp, kp1, kx2, kp2 = jax.random.split(key, 5)

    def check(out, ref, tag):
        err = float(jnp.max(jnp.abs(out - ref)))
        assert jnp.allclose(out, ref, atol=2e-3, rtol=2e-3), (
            f"{tag}: mismatch vs reference (max abs err = {err})")

    # --- Test 1: fused path, num_layers=3 (batch not sublane-aligned -> mask) ---
    num_layers, input_dim, hidden_dim, output_dim, batch = 3, 16, 32, 8, 8
    x = jax.random.normal(kx, (batch, input_dim), jnp.float32)
    params = init_mlp_params(kp, num_layers, input_dim, hidden_dim, output_dim)
    prep = prepare_mlp_params(params)
    out = jax.block_until_ready(
        mlp_forward(prep, x, num_layers=num_layers, output_dim=output_dim))
    assert out.shape == (batch, output_dim)
    check(out, mlp_reference(params, x, num_layers), "fused 3-layer")

    # --- Test 2: num_layers == 1 (plain Linear) ---
    params1 = init_mlp_params(kp1, 1, input_dim, hidden_dim, output_dim)
    prep1 = prepare_mlp_params(params1)
    out1 = jax.block_until_ready(
        mlp_forward(prep1, x, num_layers=1, output_dim=output_dim))
    assert out1.shape == (batch, output_dim)
    check(out1, mlp_reference(params1, x, 1), "single linear")

    # --- Test 3: tiled fallback path (single-K and multi-K kernels) ---
    nl2, in2, hid2, out_d2, batch2 = 2, 16, 1536, 8, 16
    x2 = jax.random.normal(kx2, (batch2, in2), jnp.float32)
    params2 = init_mlp_params(kp2, nl2, in2, hid2, out_d2)
    prep2 = prepare_mlp_params(params2)
    out2 = jax.block_until_ready(
        mlp_forward(prep2, x2, num_layers=nl2, output_dim=out_d2,
                    use_fused=False))
    assert out2.shape == (batch2, out_d2)
    check(out2, mlp_reference(params2, x2, nl2), "tiled 2-layer")

    print("KERNEL_OK")
</pallas_src>

<mosaic_0001>
module attributes {stable_mosaic.version = 11 : i64} {
  func.func @kernel(%arg0: memref<16x128xbf16, #tpu.memory_space<vmem>>, %arg1: memref<128x128xbf16, #tpu.memory_space<vmem>>, %arg2: memref<1x128xf32, #tpu.memory_space<vmem>>, %arg3: memref<1x128xf32, #tpu.memory_space<vmem>>, %arg4: memref<1x128xf32, #tpu.memory_space<vmem>>, %arg5: memref<128x128xbf16, #tpu.memory_space<vmem>>, %arg6: memref<1x128xf32, #tpu.memory_space<vmem>>, %arg7: memref<1x128xf32, #tpu.memory_space<vmem>>, %arg8: memref<1x128xf32, #tpu.memory_space<vmem>>, %arg9: memref<128x128xbf16, #tpu.memory_space<vmem>>, %arg10: memref<1x128xf32, #tpu.memory_space<vmem>>, %arg11: memref<16x128xf32, #tpu.memory_space<vmem>>) attributes {dimension_semantics = [], scalar_prefetch = 0 : i64, scratch_operands = 0 : i64, tpu.core_type = #tpu.core_type<tc>} {
    %c0 = arith.constant 0 : index
    %c0_0 = arith.constant 0 : index
    %0 = vector.load %arg0[%c0, %c0_0] : memref<16x128xbf16, #tpu.memory_space<vmem>>, vector<16x128xbf16>
    %c0_1 = arith.constant 0 : index
    %c0_2 = arith.constant 0 : index
    %1 = vector.load %arg1[%c0_1, %c0_2] : memref<128x128xbf16, #tpu.memory_space<vmem>>, vector<128x128xbf16>
    %cst = arith.constant dense<0.000000e+00> : vector<16x128xf32>
    %2 = tpu.matmul %0, %1, %cst {dimension_numbers = #tpu.dot_dimension_numbers<[1], [0], [0], [1], [0, 0, 1, 1], [], []>} : vector<16x128xbf16>, vector<128x128xbf16>, vector<16x128xf32> -> vector<16x128xf32>
    %c0_3 = arith.constant 0 : index
    %c0_4 = arith.constant 0 : index
    %3 = vector.load %arg2[%c0_3, %c0_4] : memref<1x128xf32, #tpu.memory_space<vmem>>, vector<1x128xf32>
    %4 = vector.broadcast %3 : vector<1x128xf32> to vector<16x128xf32>
    %5 = arith.addf %2, %4 : vector<16x128xf32>
    %c0_5 = arith.constant 0 : index
    %c0_6 = arith.constant 0 : index
    %6 = vector.load %arg3[%c0_5, %c0_6] : memref<1x128xf32, #tpu.memory_space<vmem>>, vector<1x128xf32>
    %c0_7 = arith.constant 0 : index
    %c0_8 = arith.constant 0 : index
    %7 = vector.load %arg4[%c0_7, %c0_8] : memref<1x128xf32, #tpu.memory_space<vmem>>, vector<1x128xf32>
    %8 = tpu.iota {dimensions = array<i32: 0>} : vector<16x128xi32>
    %c8_i32 = arith.constant 8 : i32
    %9 = vector.broadcast %c8_i32 : i32 to vector<16x128xi32>
    %10 = arith.cmpi slt, %8, %9 : vector<16x128xi32>
    %cst_9 = arith.constant 0.000000e+00 : f32
    %11 = vector.broadcast %cst_9 : f32 to vector<16x128xf32>
    %12 = arith.select %10, %5, %11 : vector<16x128xi1>, vector<16x128xf32>
    %cst_10 = arith.constant dense<0.000000e+00> : vector<128xf32>
    %13 = vector.multi_reduction <add>, %12, %cst_10 [0] : vector<16x128xf32> to vector<128xf32>
    %14 = vector.shape_cast %13 : vector<128xf32> to vector<1x128xf32>
    %cst_11 = arith.constant 1.250000e-01 : f32
    %15 = vector.broadcast %cst_11 : f32 to vector<1x128xf32>
    %16 = arith.mulf %14, %15 : vector<1x128xf32>
    %17 = vector.broadcast %16 : vector<1x128xf32> to vector<16x128xf32>
    %18 = arith.subf %5, %17 : vector<16x128xf32>
    %cst_12 = arith.constant 0.000000e+00 : f32
    %19 = vector.broadcast %cst_12 : f32 to vector<16x128xf32>
    %20 = arith.select %10, %18, %19 : vector<16x128xi1>, vector<16x128xf32>
    %21 = arith.mulf %20, %20 : vector<16x128xf32>
    %cst_13 = arith.constant dense<0.000000e+00> : vector<128xf32>
    %22 = vector.multi_reduction <add>, %21, %cst_13 [0] : vector<16x128xf32> to vector<128xf32>
    %23 = vector.shape_cast %22 : vector<128xf32> to vector<1x128xf32>
    %cst_14 = arith.constant 1.250000e-01 : f32
    %24 = vector.broadcast %cst_14 : f32 to vector<1x128xf32>
    %25 = arith.mulf %23, %24 : vector<1x128xf32>
    %cst_15 = arith.constant 9.99999974E-6 : f32
    %26 = vector.broadcast %cst_15 : f32 to vector<1x128xf32>
    %27 = arith.addf %25, %26 : vector<1x128xf32>
    %28 = math.rsqrt %27 : vector<1x128xf32>
    %29 = vector.broadcast %28 : vector<1x128xf32> to vector<16x128xf32>
    %30 = arith.mulf %18, %29 : vector<16x128xf32>
    %31 = vector.broadcast %6 : vector<1x128xf32> to vector<16x128xf32>
    %32 = arith.mulf %30, %31 : vector<16x128xf32>
    %33 = vector.broadcast %7 : vector<1x128xf32> to vector<16x128xf32>
    %34 = arith.addf %32, %33 : vector<16x128xf32>
    %cst_16 = arith.constant 0.000000e+00 : f32
    %35 = vector.broadcast %cst_16 : f32 to vector<16x128xf32>
    %36 = arith.maximumf %34, %35 : vector<16x128xf32>
    %37 = arith.truncf %36 : vector<16x128xf32> to vector<16x128xbf16>
    %c0_17 = arith.constant 0 : index
    %c0_18 = arith.constant 0 : index
    %38 = vector.load %arg5[%c0_17, %c0_18] : memref<128x128xbf16, #tpu.memory_space<vmem>>, vector<128x128xbf16>
    %cst_19 = arith.constant dense<0.000000e+00> : vector<16x128xf32>
    %39 = tpu.matmul %37, %38, %cst_19 {dimension_numbers = #tpu.dot_dimension_numbers<[1], [0], [0], [1], [0, 0, 1, 1], [], []>} : vector<16x128xbf16>, vector<128x128xbf16>, vector<16x128xf32> -> vector<16x128xf32>
    %c0_20 = arith.constant 0 : index
    %c0_21 = arith.constant 0 : index
    %40 = vector.load %arg6[%c0_20, %c0_21] : memref<1x128xf32, #tpu.memory_space<vmem>>, vector<1x128xf32>
    %41 = vector.broadcast %40 : vector<1x128xf32> to vector<16x128xf32>
    %42 = arith.addf %39, %41 : vector<16x128xf32>
    %c0_22 = arith.constant 0 : index
    %c0_23 = arith.constant 0 : index
    %43 = vector.load %arg7[%c0_22, %c0_23] : memref<1x128xf32, #tpu.memory_space<vmem>>, vector<1x128xf32>
    %c0_24 = arith.constant 0 : index
    %c0_25 = arith.constant 0 : index
    %44 = vector.load %arg8[%c0_24, %c0_25] : memref<1x128xf32, #tpu.memory_space<vmem>>, vector<1x128xf32>
    %45 = tpu.iota {dimensions = array<i32: 0>} : vector<16x128xi32>
    %c8_i32_26 = arith.constant 8 : i32
    %46 = vector.broadcast %c8_i32_26 : i32 to vector<16x128xi32>
    %47 = arith.cmpi slt, %45, %46 : vector<16x128xi32>
    %cst_27 = arith.constant 0.000000e+00 : f32
    %48 = vector.broadcast %cst_27 : f32 to vector<16x128xf32>
    %49 = arith.select %47, %42, %48 : vector<16x128xi1>, vector<16x128xf32>
    %cst_28 = arith.constant dense<0.000000e+00> : vector<128xf32>
    %50 = vector.multi_reduction <add>, %49, %cst_28 [0] : vector<16x128xf32> to vector<128xf32>
    %51 = vector.shape_cast %50 : vector<128xf32> to vector<1x128xf32>
    %cst_29 = arith.constant 1.250000e-01 : f32
    %52 = vector.broadcast %cst_29 : f32 to vector<1x128xf32>
    %53 = arith.mulf %51, %52 : vector<1x128xf32>
    %54 = vector.broadcast %53 : vector<1x128xf32> to vector<16x128xf32>
    %55 = arith.subf %42, %54 : vector<16x128xf32>
    %cst_30 = arith.constant 0.000000e+00 : f32
    %56 = vector.broadcast %cst_30 : f32 to vector<16x128xf32>
    %57 = arith.select %47, %55, %56 : vector<16x128xi1>, vector<16x128xf32>
    %58 = arith.mulf %57, %57 : vector<16x128xf32>
    %cst_31 = arith.constant dense<0.000000e+00> : vector<128xf32>
    %59 = vector.multi_reduction <add>, %58, %cst_31 [0] : vector<16x128xf32> to vector<128xf32>
    %60 = vector.shape_cast %59 : vector<128xf32> to vector<1x128xf32>
    %cst_32 = arith.constant 1.250000e-01 : f32
    %61 = vector.broadcast %cst_32 : f32 to vector<1x128xf32>
    %62 = arith.mulf %60, %61 : vector<1x128xf32>
    %cst_33 = arith.constant 9.99999974E-6 : f32
    %63 = vector.broadcast %cst_33 : f32 to vector<1x128xf32>
    %64 = arith.addf %62, %63 : vector<1x128xf32>
    %65 = math.rsqrt %64 : vector<1x128xf32>
    %66 = vector.broadcast %65 : vector<1x128xf32> to vector<16x128xf32>
    %67 = arith.mulf %55, %66 : vector<16x128xf32>
    %68 = vector.broadcast %43 : vector<1x128xf32> to vector<16x128xf32>
    %69 = arith.mulf %67, %68 : vector<16x128xf32>
    %70 = vector.broadcast %44 : vector<1x128xf32> to vector<16x128xf32>
    %71 = arith.addf %69, %70 : vector<16x128xf32>
    %cst_34 = arith.constant 0.000000e+00 : f32
    %72 = vector.broadcast %cst_34 : f32 to vector<16x128xf32>
    %73 = arith.maximumf %71, %72 : vector<16x128xf32>
    %74 = arith.truncf %73 : vector<16x128xf32> to vector<16x128xbf16>
    %c0_35 = arith.constant 0 : index
    %c0_36 = arith.constant 0 : index
    %75 = vector.load %arg9[%c0_35, %c0_36] : memref<128x128xbf16, #tpu.memory_space<vmem>>, vector<128x128xbf16>
    %cst_37 = arith.constant dense<0.000000e+00> : vector<16x128xf32>
    %76 = tpu.matmul %74, %75, %cst_37 {dimension_numbers = #tpu.dot_dimension_numbers<[1], [0], [0], [1], [0, 0, 1, 1], [], []>} : vector<16x128xbf16>, vector<128x128xbf16>, vector<16x128xf32> -> vector<16x128xf32>
    %c0_38 = arith.constant 0 : index
    %c0_39 = arith.constant 0 : index
    %77 = vector.load %arg10[%c0_38, %c0_39] : memref<1x128xf32, #tpu.memory_space<vmem>>, vector<1x128xf32>
    %78 = vector.broadcast %77 : vector<1x128xf32> to vector<16x128xf32>
    %79 = arith.addf %76, %78 : vector<16x128xf32>
    %c0_40 = arith.constant 0 : index
    %c0_41 = arith.constant 0 : index
    %80 = vector.load %arg11[%c0_40, %c0_41] : memref<16x128xf32, #tpu.memory_space<vmem>>, vector<16x128xf32>
    tpu.vector_store %arg11[%c0_40, %c0_41], %79 {strides = array<i32>} : memref<16x128xf32, #tpu.memory_space<vmem>>, vector<16x128xf32>,
    return
  }
}

</mosaic_0001>

<bundles_post_ra>
// kernel: mlp_forward.1
= control target key start
LH: loop header
LB: loop body
LE: loop exit
PB: predicated region body
PF: predicated region fallthrough
CT: control target
= control target key end

     0   :  { %16 = vsyncpa [#allocation3], 0  ;;  %s777_s0 = inlined_call_operand.vmem [shape: bf16[16,128], index: 0, kind: input, shape index: {}]   ;;  %s778_s1 = inlined_call_operand.hbm [shape: bf16[128,128], index: 1, kind: input, shape index: {}]   ;;  %s779_s2 = inlined_call_operand.vmem [shape: f32[1,128], index: 2, kind: input, shape index: {}]   ;;  %s780_s3 = inlined_call_operand.vmem [shape: f32[1,128], index: 3, kind: input, shape index: {}]   ;;  %s781_s4 = inlined_call_operand.vmem [shape: f32[1,128], index: 4, kind: input, shape index: {}]   ;;  %s782_s5 = inlined_call_operand.hbm [shape: bf16[128,128], index: 5, kind: input, shape index: {}]   ;;  %s783_s6 = inlined_call_operand.vmem [shape: f32[1,128], index: 6, kind: input, shape index: {}]   ;;  %s784_s7 = inlined_call_operand.vmem [shape: f32[1,128], index: 7, kind: input, shape index: {}]   ;;  %s785_s8 = inlined_call_operand.vmem [shape: f32[1,128], index: 8, kind: input, shape index: {}]   ;;  %s786_s9 = inlined_call_operand.hbm [shape: bf16[128,128], index: 9, kind: input, shape index: {}]   ;;  %s787_s10 = inlined_call_operand.vmem [shape: f32[1,128], index: 10, kind: input, shape index: {}]   ;;  %s788_s11 = inlined_call_operand.vmem [shape: f32[16,128], index: 11, kind: output, shape index: {}]  }
   0x1   :  { %17 = vsyncpa [#allocation5], 0  ;;  %s43_s19 = sshll.u32 %s782_s5, 4  ;;  %s673_s20 = smov [#allocation4]   ;;  %s44_s19 = int_to_ptr.hbm [resolvable:$true] %s43_s19 }
   0x2   :  { %s45_s21 = sshll.u32 %s673_s20, 4  ;;  %s24_s24 = sshll.u32 %s778_s1, 4  ;;  %s46_s21 = int_to_ptr.vmem [resolvable:$true] %s45_s21  ;;  %s25_s24 = int_to_ptr.hbm [resolvable:$true] %s24_s24 }
   0x3   :  { %s674_s25 = smov 64   ;;  %s675_s26 = smov 4  }
   0x4   :  { %51 = dma.hbm_to_vmem [thread:$0]  %s44_s19, 1024, %s46_s21, [#allocation5], %s674_s25, %s674_s25, %s675_s26  }
   0x5   :  { %s676_s27 = smov [#allocation2]   ;;  %s62_s12 = sshll.u32 %s786_s9, 4  ;;  %s63_s12 = int_to_ptr.hbm [resolvable:$true] %s62_s12 }
   0x6   :  { %s26_s28 = sshll.u32 %s676_s27, 4  ;;  %s677_s5 = smov [#allocation6]   ;;  %s27_s28 = int_to_ptr.vmem [resolvable:$true] %s26_s28 }
   0x7   :  { %32 = dma.hbm_to_vmem [thread:$0]  %s25_s24, 1024, %s27_s28, [#allocation3], %s674_s25, %s674_s25, %s675_s26  }
   0x8   :  { %s64_s13 = sshll.u32 %s677_s5, 4  ;;  %s65_s13 = int_to_ptr.vmem [resolvable:$true] %s64_s13 }
   0x9   :  { %70 = dma.hbm_to_vmem [thread:$0]  %s63_s12, 1024, %s65_s13, [#allocation5], %s674_s25, %s674_s25, %s675_s26  }
   0xa   :  { %669 = dma.done.wait [#allocation3], 1024  }
   0xb   :  { %670 = vsyncadd [#allocation3], 4294966272 }
   0xc   :  { %671 = dma.done.wait [#allocation5], 2048  }
   0xd   :  { %672 = vsyncadd [#allocation5], 4294965248  ;;  %v564_v0 = vld [vmem:[#allocation2 + $0x38] sm:$0xff]  ;;  %v563_v1 = vld [vmem:[#allocation2 + $0x30] sm:$0xff] }
   0xe   :  { %161 = vmatpush.bf16.msra.mxu0 %v564_v0  ;;  %v562_v2 = vld [vmem:[#allocation2 + $0x28] sm:$0xff]  ;;  %v561_v3 = vld [vmem:[#allocation2 + $0x20] sm:$0xff]  ;;  %v560_v4 = vld [vmem:[#allocation2 + $0x18] sm:$0xff] }
   0xf   :  { %v559_v5 = vld [vmem:[#allocation2 + $0x10] sm:$0xff]  ;;  %v558_v6 = vld [vmem:[#allocation2 + $0x8] sm:$0xff]  ;;  %v557_v7 = vld [vmem:[#allocation2] sm:$0xff] }
  0x10   :  { %v556_v8 = vld [vmem:[%s777_s0] sm:$0xff]  ;;  %v572_v11 = vld [vmem:[#allocation4 + $0x38] sm:$0xff]  ;;  %v571_v14 = vld [vmem:[#allocation4 + $0x30] sm:$0xff] }
  0x11   :  { %v586_v9 = vld [vmem:[%s779_s2] ss:$0 sm:$0xff]  ;;  %300 = vmatpush.bf16.msra.mxu1 %v572_v11  ;;  %v570_v17 = vld [vmem:[#allocation4 + $0x28] sm:$0xff]  ;;  %v568_v23 = vld [vmem:[#allocation4 + $0x18] sm:$0xff] }
  0x12   :  { %162 = vmatpush.bf16.msra.mxu0 %v563_v1  ;;  %v569_v20 = vld [vmem:[#allocation4 + $0x20] sm:$0xff]  ;;  %v567_v26 = vld [vmem:[#allocation4 + $0x10] sm:$0xff]  ;;  %v566_v29 = vld [vmem:[#allocation4 + $0x8] sm:$0xff] }
  0x13   :  { %v565_v31 = vld [vmem:[#allocation4] sm:$0xff]  ;;  %v580_v60 = vld [vmem:[#allocation6 + $0x38] sm:$0xff]  ;;  %v579_v63 = vld [vmem:[#allocation6 + $0x30] sm:$0xff] }
  0x14   :  { %v587_v46 = vld [vmem:[%s780_s3] ss:$0 sm:$0xff]  ;;  %434 = vmatpush.bf16.msra.mxu2 %v580_v60  ;;  %v575_v11 = vld [vmem:[#allocation6 + $0x10] sm:$0xff] }
  0x15   :  { %301 = vmatpush.bf16.msra.mxu1 %v571_v14  ;;  %v588_v50 = vld [vmem:[%s781_s4] ss:$0 sm:$0xff]  ;;  %v574_v14 = vld [vmem:[#allocation6 + $0x8] sm:$0xff] }
  0x16   :  { %163 = vmatpush.bf16.msra.mxu0 %v562_v2  ;;  %v589_v58 = vld [vmem:[%s783_s6] ss:$0 sm:$0xff]  ;;  %v578_v2 = vld [vmem:[#allocation6 + $0x28] sm:$0xff] }
  0x18   :  { %435 = vmatpush.bf16.msra.mxu2 %v579_v63 }
  0x19   :  { %302 = vmatpush.bf16.msra.mxu1 %v570_v17 }
  0x1a   :  { %164 = vmatpush.bf16.msra.mxu0 %v561_v3 }
  0x1c   :  { %436 = vmatpush.bf16.msra.mxu2 %v578_v2 }
  0x1d   :  { %303 = vmatpush.bf16.msra.mxu1 %v569_v20 }
  0x1e   :  { %165 = vmatpush.bf16.msra.mxu0 %v560_v4 }
  0x21   :  { %304 = vmatpush.bf16.msra.mxu1 %v568_v23 }
  0x22   :  { %166 = vmatpush.bf16.msra.mxu0 %v559_v5  ;;  %v577_v5 = vld [vmem:[#allocation6 + $0x20] sm:$0xff] }
  0x23   :  { %437 = vmatpush.bf16.msra.mxu2 %v577_v5 }
  0x25   :  { %305 = vmatpush.bf16.msra.mxu1 %v567_v26 }
  0x26   :  { %167 = vmatpush.bf16.msra.mxu0 %v558_v6 }
  0x29   :  { %306 = vmatpush.bf16.msra.mxu1 %v566_v29 }
  0x2a   :  { %168 = vmatpush.bf16.msra.mxu0 %v557_v7 }
  0x2d   :  { %169 = vmatmul.bf16.vlgmr.msra.gmra.mxu0 %v556_v8  ;;  %307 = vmatpush.bf16.msra.mxu1 %v565_v31  ;;  %v576_v8 = vld [vmem:[#allocation6 + $0x18] sm:$0xff]  ;;  %v590_v31 = vld [vmem:[%s784_s7] ss:$0 sm:$0xff] }
  0x2e   :  { %438 = vmatpush.bf16.msra.mxu2 %v576_v8 }
  0x32   :  { %439 = vmatpush.bf16.msra.mxu2 %v575_v11 }
  0x36   :  { %440 = vmatpush.bf16.msra.mxu2 %v574_v14 }
  0xaa   :  { %v170_v10 = vpop.f32.mrf.mxu0 }
  0xab   :  { %v171_v12 = vadd.f32 %v586_v9, %v170_v10 }
  0xad   :  { %v185_v13 = vrot.slane %v171_v12, 4 }
  0xaf   :  { %v186_v15 = vadd.f32 %v185_v13, %v171_v12 }
  0xb1   :  { %v187_v16 = vrot.slane %v186_v15, 2 }
  0xb2   :  { %v172_v40 = vpop.f32.mrf.mxu0 }
  0xb3   :  { %v188_v18 = vadd.f32 %v187_v16, %v186_v15  ;;  %v173_v43 = vadd.f32 %v586_v9, %v172_v40  ;;  %v573_v16 = vld [vmem:[#allocation6] sm:$0xff] }
  0xb4   :  { %441 = vmatpush.bf16.msra.mxu2 %v573_v16 }
  0xb5   :  { %v189_v19 = vrot.slane %v188_v18, 1 }
  0xb7   :  { %v190_v21 = vadd.f32 %v189_v19, %v188_v18 }
  0xb9   :  { %v191_v22 = vmul.f32 0.125, %v190_v21 }
  0xbb   :  { %v192_v24 = vsub.f32 %v171_v12, %v191_v22  ;;  %v193_v45 = vsub.f32 %v173_v43, %v191_v22  ;;  %v592_v43 = vld [vmem:[%s787_s10] ss:$0 sm:$0xff] }
  0xbd   :  { %v196_v25 = vmul.f32 %v192_v24, %v192_v24 }
  0xbf   :  { %v199_v27 = vrot.slane %v196_v25, 4 }
  0xc1   :  { %v200_v28 = vadd.f32 %v199_v27, %v196_v25 }
  0xc3   :  { %v201_v30 = vrot.slane %v200_v28, 2 }
  0xc5   :  { %v202_v32 = vadd.f32 %v201_v30, %v200_v28 }
  0xc7   :  { %v203_v33 = vrot.slane %v202_v32, 1 }
  0xc9   :  { %v204_v34 = vadd.f32 %v203_v33, %v202_v32 }
  0xcb   :  { %v205_v35 = vmul.f32 0.125, %v204_v34 }
  0xcd   :  { %v206_v36 = vadd.f32 1e-05, %v205_v35  ;;  %v591_v35 = vld [vmem:[%s785_s8] ss:$0 sm:$0xff] }
  0xcf   :  { %593 = vrsqrt.f32 %v206_v36  ;;  %vm213_vm1 = vweird.f32 %v206_v36 }
  0xd5   :  { %v594_v37 = vpop.eup %593 }
  0xd6   :  { %v208_v38 = vmul.f32 %v594_v37, %v206_v36  ;;  %vm214_vm0 = vweird.f32 %v594_v37 }
  0xd7   :  { %vm215_vm2 = vmor %vm213_vm1, %vm214_vm0 }
  0xd8   :  { %v209_v39 = vmul.f32 %v594_v37, %v208_v38 }
  0xda   :  { %v210_v41 = vmul.f32 0.5, %v209_v39 }
  0xdc   :  { %v211_v42 = vsub.f32 1.5, %v210_v41 }
  0xde   :  { %v212_v44 = vmul.f32 %v594_v37, %v211_v42 }
  0xe0   :  { %v216_v47 = vsel %vm215_vm2, %v594_v37, %v212_v44 }
  0xe1   :  { %v217_v48 = vmul.f32 %v216_v47, %v192_v24  ;;  %v218_v49 = vmul.f32 %v216_v47, %v193_v45 }
  0xe3   :  { %v222_v51 = vmul.f32 %v587_v46, %v217_v48  ;;  %v223_v52 = vmul.f32 %v587_v46, %v218_v49 }
  0xe5   :  { %v227_v53 = vadd.f32 %v588_v50, %v222_v51  ;;  %v228_v54 = vadd.f32 %v588_v50, %v223_v52 }
  0xe7   :  { %v229_v55 = vmax.f32 %v227_v53, 0.0  ;;  %v230_v56 = vmax.f32 %v228_v54, 0.0 }
  0xe9   :  { %v231_v57 = vpack.c.bf16 %v230_v56, %v229_v55 }
  0xeb   :  { %308 = vmatmul.bf16.vlgmr.msra.gmra.mxu1 %v231_v57 }
 0x168   :  { %v309_v59 = vpop.f32.mrf.mxu1 }
 0x169   :  { %v310_v61 = vadd.f32 %v589_v58, %v309_v59 }
 0x16b   :  { %v319_v62 = vrot.slane %v310_v61, 4 }
 0x16d   :  { %v320_v0 = vadd.f32 %v319_v62, %v310_v61 }
 0x16f   :  { %v321_v1 = vrot.slane %v320_v0, 2 }
 0x170   :  { %v311_v25 = vpop.f32.mrf.mxu1 }
 0x171   :  { %v322_v3 = vadd.f32 %v321_v1, %v320_v0  ;;  %v312_v28 = vadd.f32 %v589_v58, %v311_v25 }
 0x173   :  { %v323_v4 = vrot.slane %v322_v3, 1 }
 0x175   :  { %v324_v6 = vadd.f32 %v323_v4, %v322_v3 }
 0x177   :  { %v325_v7 = vmul.f32 0.125, %v324_v6 }
 0x179   :  { %v326_v9 = vsub.f32 %v310_v61, %v325_v7  ;;  %v327_v30 = vsub.f32 %v312_v28, %v325_v7 }
 0x17b   :  { %v330_v10 = vmul.f32 %v326_v9, %v326_v9 }
 0x17d   :  { %v333_v12 = vrot.slane %v330_v10, 4 }
 0x17f   :  { %v334_v13 = vadd.f32 %v333_v12, %v330_v10 }
 0x181   :  { %v335_v15 = vrot.slane %v334_v13, 2 }
 0x183   :  { %v336_v17 = vadd.f32 %v335_v15, %v334_v13 }
 0x185   :  { %v337_v18 = vrot.slane %v336_v17, 1 }
 0x187   :  { %v338_v19 = vadd.f32 %v337_v18, %v336_v17 }
 0x189   :  { %v339_v20 = vmul.f32 0.125, %v338_v19 }
 0x18b   :  { %v340_v21 = vadd.f32 1e-05, %v339_v20 }
 0x18d   :  { %595 = vrsqrt.f32 %v340_v21  ;;  %vm347_vm4 = vweird.f32 %v340_v21 }
 0x193   :  { %v596_v22 = vpop.eup %595 }
 0x194   :  { %v342_v23 = vmul.f32 %v596_v22, %v340_v21  ;;  %vm348_vm3 = vweird.f32 %v596_v22 }
 0x195   :  { %vm349_vm5 = vmor %vm347_vm4, %vm348_vm3 }
 0x196   :  { %v343_v24 = vmul.f32 %v596_v22, %v342_v23 }
 0x198   :  { %v344_v26 = vmul.f32 0.5, %v343_v24 }
 0x19a   :  { %v345_v27 = vsub.f32 1.5, %v344_v26 }
 0x19c   :  { %v346_v29 = vmul.f32 %v596_v22, %v345_v27 }
 0x19e   :  { %v350_v32 = vsel %vm349_vm5, %v596_v22, %v346_v29 }
 0x19f   :  { %v351_v33 = vmul.f32 %v350_v32, %v326_v9  ;;  %v352_v34 = vmul.f32 %v350_v32, %v327_v30 }
 0x1a1   :  { %v356_v36 = vmul.f32 %v590_v31, %v351_v33  ;;  %v357_v37 = vmul.f32 %v590_v31, %v352_v34 }
 0x1a3   :  { %v361_v38 = vadd.f32 %v591_v35, %v356_v36  ;;  %v362_v39 = vadd.f32 %v591_v35, %v357_v37 }
 0x1a5   :  { %v363_v40 = vmax.f32 %v361_v38, 0.0  ;;  %v364_v41 = vmax.f32 %v362_v39, 0.0 }
 0x1a7   :  { %v365_v42 = vpack.c.bf16 %v364_v41, %v363_v40 }
 0x1a9   :  { %442 = vmatmul.bf16.vlgmr.msra.gmra.mxu2 %v365_v42 }
 0x22c   :  { %v443_v44 = vpop.f32.mrf.mxu2 }
 0x22d   :  { %v444_v45 = vadd.f32 %v592_v43, %v443_v44 }
 0x22f   :  { %448 = vst [vmem:[%s788_s11] sm:$0xff] %v444_v45 }
 0x234   :  { %v445_v46 = vpop.f32.mrf.mxu2 }
 0x235   :  { %v446_v47 = vadd.f32 %v592_v43, %v445_v46 }
 0x237   :  { %449 = vst [vmem:[%s788_s11 + $0x8] sm:$0xff] %v446_v47 }
 0x238   :  { %454 = vsyncpa [#allocation3], 1 }
 0x239   :  { %455 = vsyncpa [#allocation5], 1 }

</bundles_post_ra>
